<compile_context>
chip_gen: v5e
topology: v5e:2x2
jax: 0.10.0
libtpu: 0.0.40
codegen_flags: <defaults>
</compile_context>

<pallas_src>
import math

import jax
import jax.numpy as jnp
from jax import lax
from jax.experimental import pallas as pl
from jax.experimental.pallas import tpu as pltpu


HIDDEN_SIZES = (64, 64)


def _xavier_uniform(key, fan_out, fan_in, dtype=jnp.float32):
    # Matches torch.nn.init.xavier_uniform_ (gain=1.0) on an [out, in] weight.
    limit = math.sqrt(6.0 / (fan_in + fan_out))
    return jax.random.uniform(
        key, (fan_out, fan_in), dtype=dtype, minval=-limit, maxval=limit
    )


def init_value_dense_net_params(key, state_dim, hidden_sizes=HIDDEN_SIZES):
    """Returns [W1, b1, W2, b2, Wf, bf]; W: [out, in] (nn.Linear layout), b: [out, 1] zeros."""
    params = []
    prev = state_dim
    sizes = tuple(hidden_sizes) + (1,)
    keys = jax.random.split(key, len(sizes))
    for k, h in zip(keys, sizes):
        params.append(_xavier_uniform(k, h, prev))             # [out, in]
        params.append(jnp.zeros((h, 1), dtype=jnp.float32))    # bias [out, 1] (lane broadcast)
        prev = h
    return params


def _mlp_kernel(x_ref, w1_ref, b1_ref, w2_ref, b2_ref, wf_ref, bf_ref, out_ref):
    # Hot path: three MXU matmuls in transposed (batch-on-lane) layout, tanh on the EUP.
    x = x_ref[...]                                              # [tile, state_dim]

    # Layer 1: W1 [h1, d] contracted with x [tile, d] on d  -> [h1, tile]   (trans_b)
    h = lax.dot_general(w1_ref[...], x, (((1,), (1,)), ((), ())),
                        preferred_element_type=jnp.float32)
    h = jnp.tanh(h + b1_ref[...]).astype(w2_ref.dtype)

    # Layer 2: W2 [h2, h1] @ h [h1, tile] -> [h2, tile]                      (canonical)
    h = lax.dot_general(w2_ref[...], h, (((1,), (0,)), ((), ())),
                        preferred_element_type=jnp.float32)
    h = jnp.tanh(h + b2_ref[...]).astype(wf_ref.dtype)

    # Value head: Wf [1, h2] @ h [h2, tile] -> [1, tile]  (lane-dense output slab)
    v = lax.dot_general(wf_ref[...], h, (((1,), (0,)), ((), ())),
                        preferred_element_type=jnp.float32)
    out_ref[...] = (v + bf_ref[...]).astype(out_ref.dtype)


def value_dense_net_forward(x, params, *, batch_tile=None, compute_dtype=jnp.float32):
    """Pallas forward pass. x: [B, state_dim] float32 -> [B, 1] float32."""
    B, state_dim = x.shape
    w1, b1, w2, b2, wf, bf = params
    h1 = w1.shape[0]
    h2 = w2.shape[0]

    # Tile selection: one big tile for small/medium batches, 1024-row tiles beyond.
    if batch_tile is None:
        if B <= 2048:
            batch_tile = max(128, ((B + 127) // 128) * 128)
        else:
            batch_tile = 1024

    num_tiles = pl.cdiv(B, batch_tile)
    b_pad = num_tiles * batch_tile
    if b_pad != B:
        x = jnp.pad(x, ((0, b_pad - B), (0, 0)))

    # Optional bf16 inputs/weights (v6e / v7x); accumulation, bias add and tanh stay f32.
    compute_dtype = jnp.dtype(compute_dtype)
    x = x.astype(compute_dtype)
    w1c = w1.astype(compute_dtype)
    w2c = w2.astype(compute_dtype)
    wfc = wf.astype(compute_dtype)

    def x_map(i):
        return (i, 0)

    def out_map(i):
        return (0, i)

    def full_map(i):
        return (0, 0)

    out = pl.pallas_call(
        _mlp_kernel,
        out_shape=jax.ShapeDtypeStruct((1, b_pad), jnp.float32),
        grid_spec=pltpu.PrefetchScalarGridSpec(
            num_scalar_prefetch=0,
            grid=(num_tiles,),
            in_specs=[
                pl.BlockSpec((batch_tile, state_dim), x_map),  # x tile
                pl.BlockSpec((h1, state_dim), full_map),       # W1 (whole, VMEM-resident)
                pl.BlockSpec((h1, 1), full_map),               # b1
                pl.BlockSpec((h2, h1), full_map),              # W2
                pl.BlockSpec((h2, 1), full_map),               # b2
                pl.BlockSpec((1, h2), full_map),               # Wf
                pl.BlockSpec((1, 1), full_map),                # bf
            ],
            out_specs=pl.BlockSpec((1, batch_tile), out_map),  # lane-dense value slab
        ),
        compiler_params=pltpu.CompilerParams(
            dimension_semantics=("parallel",),
        ),
    )(x, w1c, b1, w2c, b2, wfc, bf)

    # (1, b_pad) -> [B, 1]
    return out.reshape(b_pad, 1)[:B]


def value_dense_net_reference(x, params):
    """Plain XLA forward (also the preferred path for tiny batches, B <= ~256)."""
    w1, b1, w2, b2, wf, bf = params
    h = jnp.tanh(x @ w1.T + b1[:, 0])
    h = jnp.tanh(h @ w2.T + b2[:, 0])
    return h @ wf.T + bf[:, 0]


if __name__ == "__main__":
    key = jax.random.PRNGKey(0)
    k_params, k_x1, k_x2 = jax.random.split(key, 3)

    state_dim = 32
    params = init_value_dense_net_params(k_params, state_dim, HIDDEN_SIZES)

    # Small batch (single padded grid step).
    batch = 8
    x = jax.random.normal(k_x1, (batch, state_dim), dtype=jnp.float32)
    value = jax.block_until_ready(value_dense_net_forward(x, params))
    ref = value_dense_net_reference(x, params)
    assert value.shape == (batch, 1)
    assert jnp.allclose(value, ref, atol=1e-5, rtol=1e-5), "mismatch vs reference (small)"

    # Non-divisible batch exercising multiple tiles + padding.
    batch2 = 300
    x2 = jax.random.normal(k_x2, (batch2, state_dim), dtype=jnp.float32)
    value2 = jax.block_until_ready(value_dense_net_forward(x2, params, batch_tile=128))
    ref2 = value_dense_net_reference(x2, params)
    assert value2.shape == (batch2, 1)
    assert jnp.allclose(value2, ref2, atol=1e-5, rtol=1e-5), "mismatch vs reference (tiled)"

    print("KERNEL_OK")
</pallas_src>

<mosaic_0001>
module attributes {stable_mosaic.version = 11 : i64} {
  func.func @_mlp_kernel(%arg0: i32, %arg1: memref<128x32xf32, #tpu.memory_space<vmem>>, %arg2: memref<64x32xf32, #tpu.memory_space<vmem>>, %arg3: memref<64x1xf32, #tpu.memory_space<vmem>>, %arg4: memref<64x64xf32, #tpu.memory_space<vmem>>, %arg5: memref<64x1xf32, #tpu.memory_space<vmem>>, %arg6: memref<1x64xf32, #tpu.memory_space<vmem>>, %arg7: memref<1x1xf32, #tpu.memory_space<vmem>>, %arg8: memref<1x128xf32, #tpu.memory_space<vmem>>) attributes {dimension_semantics = [#tpu.dimension_semantics<parallel>], iteration_bounds = array<i64: 1>, scalar_prefetch = 0 : i64, scratch_operands = 0 : i64, tpu.core_type = #tpu.core_type<tc>, window_params = [{transform_indices = @transform_0, window_bounds = array<i64: 128, 32>}, {pipeline_mode = #tpu.pipeline_mode<synchronous>, transform_indices = @transform_1, window_bounds = array<i64: 64, 32>}, {pipeline_mode = #tpu.pipeline_mode<synchronous>, transform_indices = @transform_2, window_bounds = array<i64: 64, 1>}, {pipeline_mode = #tpu.pipeline_mode<synchronous>, transform_indices = @transform_3, window_bounds = array<i64: 64, 64>}, {pipeline_mode = #tpu.pipeline_mode<synchronous>, transform_indices = @transform_4, window_bounds = array<i64: 64, 1>}, {pipeline_mode = #tpu.pipeline_mode<synchronous>, transform_indices = @transform_5, window_bounds = array<i64: 1, 64>}, {pipeline_mode = #tpu.pipeline_mode<synchronous>, transform_indices = @transform_6, window_bounds = array<i64: 1, 1>}, {transform_indices = @transform_7, window_bounds = array<i64: 1, 128>}]} {
    %c0 = arith.constant 0 : index
    %c0_0 = arith.constant 0 : index
    %0 = vector.load %arg1[%c0, %c0_0] : memref<128x32xf32, #tpu.memory_space<vmem>>, vector<128x32xf32>
    %c0_1 = arith.constant 0 : index
    %c0_2 = arith.constant 0 : index
    %1 = vector.load %arg2[%c0_1, %c0_2] : memref<64x32xf32, #tpu.memory_space<vmem>>, vector<64x32xf32>
    %cst = arith.constant dense<0.000000e+00> : vector<64x128xf32>
    %2 = tpu.matmul %1, %0, %cst {dimension_numbers = #tpu.dot_dimension_numbers<[1], [1], [0], [0], [0, 0, 1, 0], [], []>} : vector<64x32xf32>, vector<128x32xf32>, vector<64x128xf32> -> vector<64x128xf32>
    %c0_3 = arith.constant 0 : index
    %c0_4 = arith.constant 0 : index
    %3 = vector.load %arg3[%c0_3, %c0_4] : memref<64x1xf32, #tpu.memory_space<vmem>>, vector<64x1xf32>
    %4 = vector.broadcast %3 : vector<64x1xf32> to vector<64x128xf32>
    %5 = arith.addf %2, %4 : vector<64x128xf32>
    %6 = math.tanh %5 : vector<64x128xf32>
    %c0_5 = arith.constant 0 : index
    %c0_6 = arith.constant 0 : index
    %7 = vector.load %arg4[%c0_5, %c0_6] : memref<64x64xf32, #tpu.memory_space<vmem>>, vector<64x64xf32>
    %cst_7 = arith.constant dense<0.000000e+00> : vector<64x128xf32>
    %8 = tpu.matmul %7, %6, %cst_7 {dimension_numbers = #tpu.dot_dimension_numbers<[1], [0], [0], [1], [0, 0, 1, 1], [], []>} : vector<64x64xf32>, vector<64x128xf32>, vector<64x128xf32> -> vector<64x128xf32>
    %c0_8 = arith.constant 0 : index
    %c0_9 = arith.constant 0 : index
    %9 = vector.load %arg5[%c0_8, %c0_9] : memref<64x1xf32, #tpu.memory_space<vmem>>, vector<64x1xf32>
    %10 = vector.broadcast %9 : vector<64x1xf32> to vector<64x128xf32>
    %11 = arith.addf %8, %10 : vector<64x128xf32>
    %12 = math.tanh %11 : vector<64x128xf32>
    %c0_10 = arith.constant 0 : index
    %c0_11 = arith.constant 0 : index
    %13 = vector.load %arg6[%c0_10, %c0_11] : memref<1x64xf32, #tpu.memory_space<vmem>>, vector<1x64xf32>
    %cst_12 = arith.constant dense<0.000000e+00> : vector<1x128xf32>
    %14 = tpu.matmul %13, %12, %cst_12 {dimension_numbers = #tpu.dot_dimension_numbers<[1], [0], [0], [1], [0, 0, 1, 1], [], []>} : vector<1x64xf32>, vector<64x128xf32>, vector<1x128xf32> -> vector<1x128xf32>
    %c0_13 = arith.constant 0 : index
    %c0_14 = arith.constant 0 : index
    %15 = vector.load %arg7[%c0_13, %c0_14] : memref<1x1xf32, #tpu.memory_space<vmem>>, vector<1x1xf32>
    %16 = vector.broadcast %15 : vector<1x1xf32> to vector<1x128xf32>
    %17 = arith.addf %14, %16 : vector<1x128xf32>
    %c0_15 = arith.constant 0 : index
    %c0_16 = arith.constant 0 : index
    %18 = vector.load %arg8[%c0_15, %c0_16] : memref<1x128xf32, #tpu.memory_space<vmem>>, vector<1x128xf32>
    tpu.vector_store %arg8[%c0_15, %c0_16], %17 {strides = array<i32>} : memref<1x128xf32, #tpu.memory_space<vmem>>, vector<1x128xf32>,
    return
  }
  func.func @transform_0(%arg0: i32) -> (i32, i32) {
    %c0_i32 = arith.constant 0 : i32
    %c0_i32_0 = arith.constant 0 : i32
    return %arg0, %c0_i32 : i32, i32
  }
  func.func @transform_1(%arg0: i32) -> (i32, i32) {
    %c0_i32 = arith.constant 0 : i32
    %c0_i32_0 = arith.constant 0 : i32
    %c0_i32_1 = arith.constant 0 : i32
    return %c0_i32, %c0_i32_0 : i32, i32
  }
  func.func @transform_2(%arg0: i32) -> (i32, i32) {
    %c0_i32 = arith.constant 0 : i32
    %c0_i32_0 = arith.constant 0 : i32
    %c0_i32_1 = arith.constant 0 : i32
    return %c0_i32, %c0_i32_0 : i32, i32
  }
  func.func @transform_3(%arg0: i32) -> (i32, i32) {
    %c0_i32 = arith.constant 0 : i32
    %c0_i32_0 = arith.constant 0 : i32
    %c0_i32_1 = arith.constant 0 : i32
    return %c0_i32, %c0_i32_0 : i32, i32
  }
  func.func @transform_4(%arg0: i32) -> (i32, i32) {
    %c0_i32 = arith.constant 0 : i32
    %c0_i32_0 = arith.constant 0 : i32
    %c0_i32_1 = arith.constant 0 : i32
    return %c0_i32, %c0_i32_0 : i32, i32
  }
  func.func @transform_5(%arg0: i32) -> (i32, i32) {
    %c0_i32 = arith.constant 0 : i32
    %c0_i32_0 = arith.constant 0 : i32
    %c0_i32_1 = arith.constant 0 : i32
    return %c0_i32, %c0_i32_0 : i32, i32
  }
  func.func @transform_6(%arg0: i32) -> (i32, i32) {
    %c0_i32 = arith.constant 0 : i32
    %c0_i32_0 = arith.constant 0 : i32
    %c0_i32_1 = arith.constant 0 : i32
    return %c0_i32, %c0_i32_0 : i32, i32
  }
  func.func @transform_7(%arg0: i32) -> (i32, i32) {
    %c0_i32 = arith.constant 0 : i32
    %c0_i32_0 = arith.constant 0 : i32
    return %c0_i32, %arg0 : i32, i32
  }
}

</mosaic_0001>

<bundles_post_ra>
// kernel: tpu_custom_call.1
= control target key start
LH: loop header
LB: loop body
LE: loop exit
PB: predicated region body
PF: predicated region fallthrough
CT: control target
= control target key end

     0   :  { %s789_s0 = inlined_call_operand.vmem [shape: f32[128,32], index: 0, kind: input, shape index: {}]   ;;  %s790_s1 = inlined_call_operand.vmem [shape: f32[64,32], index: 1, kind: input, shape index: {}]   ;;  %s791_s2 = inlined_call_operand.vmem [shape: f32[64,1], index: 2, kind: input, shape index: {}]   ;;  %s792_s3 = inlined_call_operand.vmem [shape: f32[64,64], index: 3, kind: input, shape index: {}]   ;;  %s793_s4 = inlined_call_operand.vmem [shape: f32[64,1], index: 4, kind: input, shape index: {}]   ;;  %s794_s5 = inlined_call_operand.vmem [shape: f32[1,64], index: 5, kind: input, shape index: {}]   ;;  %s795_s6 = inlined_call_operand.<no memory space> [shape: f32[1,1], index: 6, kind: input, shape index: {}]   ;;  %s796_s7 = inlined_call_operand.hbm [shape: f32[1,128], index: 7, kind: output, shape index: {}]  }
   0x1   :  { %v12_v0 = vstv %s795_s6 }
   0x2   :  { %13 = vst [vmem:[#allocation2] sm:$0x1] %v12_v0 }
   0x3   :  { %v44_v1 = vld [vmem:[%s789_s0 + $0x78] sm:$0xff]  ;;  %vm101_vm0 = vcmask 261120   ;;  %v43_v2 = vld [vmem:[%s789_s0 + $0x70] sm:$0xff] }
   0x4   :  { %435 = vmatpush.xpose.msk.msra.mxu3 %vm101_vm0, %v44_v1  ;;  %434 = vmatpush.xpose.msk.msra.mxu2 %vm101_vm0, %v44_v1 }
   0x5   :  { %401 = vmatpush.xpose.msk.msra.mxu0 %vm101_vm0, %v44_v1 }
   0x6   :  { %14 = vsyncpa [#allocation4], 0  ;;  %v42_v3 = vld [vmem:[%s789_s0 + $0x68] sm:$0xff]  ;;  %v41_v4 = vld [vmem:[%s789_s0 + $0x60] sm:$0xff]  ;;  %v529_v8 = vmov 0   ;;  %vm279_vm1 = vcmask 523264  }
   0x7   :  { %v40_v5 = vld [vmem:[%s789_s0 + $0x58] sm:$0xff]  ;;  %v39_v7 = vld [vmem:[%s789_s0 + $0x50] sm:$0xff]  ;;  %468 = vset.pattern.permute.xlu0 %v529_v8  ;;  %469 = vset.pattern.permute.xlu1 %v529_v8  ;;  %v58_v9 = vld [vmem:[%s791_s2 + $0x28] sm:$0xff]  ;;  %s530_s21 = smov [#allocation3]   ;;  %s392_s25 = sshll.u32 %s796_s7, 4  ;;  %s393_s25 = int_to_ptr.hbm [resolvable:$true] %s392_s25 }
   0x8   :  { %437 = vmatpush.xpose.msk.msra.mxu3 %vm101_vm0, %v43_v2  ;;  %436 = vmatpush.xpose.msk.msra.mxu2 %vm101_vm0, %v43_v2  ;;  %v60_v6 = vld [vmem:[%s791_s2 + $0x38] sm:$0xff]  ;;  %v38_v10 = vld [vmem:[%s789_s0 + $0x48] sm:$0xff]  ;;  %v59_v11 = vld [vmem:[%s791_s2 + $0x30] sm:$0xff]  ;;  %s390_s22 = sshll.u32 %s530_s21, 4  ;;  %s391_s22 = int_to_ptr.vmem [resolvable:$true] %s390_s22 }
   0x9   :  { %402 = vmatpush.xpose.msk.msra.mxu0 %vm101_vm0, %v43_v2  ;;  %98 = vperm.xlu0 %468, %v60_v6   ;;  %v37_v12 = vld [vmem:[%s789_s0 + $0x40] sm:$0xff]  ;;  %v36_v14 = vld [vmem:[%s789_s0 + $0x38] sm:$0xff]  ;;  %v54_v15 = vld [vmem:[%s791_s2 + $0x8] sm:$0xff] }
   0xa   :  { %470 = vset.pattern.permute.xlu2 %v529_v8  ;;  %88 = vperm.xlu1 %469, %v58_v9   ;;  %v57_v13 = vld [vmem:[%s791_s2 + $0x20] sm:$0xff]  ;;  %v35_v16 = vld [vmem:[%s789_s0 + $0x30] sm:$0xff]  ;;  %v34_v18 = vld [vmem:[%s789_s0 + $0x28] sm:$0xff] }
   0xb   :  { %v53_v17 = vld [vmem:[%s791_s2] sm:$0xff]  ;;  %v237_v19 = vld [vmem:[%s793_s4 + $0x30] sm:$0xff]  ;;  %v236_v21 = vld [vmem:[%s793_s4 + $0x28] sm:$0xff] }
   0xc   :  { %439 = vmatpush.xpose.msk.msra.mxu3 %vm101_vm0, %v42_v3  ;;  %438 = vmatpush.xpose.msk.msra.mxu2 %vm101_vm0, %v42_v3  ;;  %v33_v20 = vld [vmem:[%s789_s0 + $0x20] sm:$0xff]  ;;  %v32_v22 = vld [vmem:[%s789_s0 + $0x18] sm:$0xff]  ;;  %v31_v25 = vld [vmem:[%s789_s0 + $0x10] sm:$0xff] }
   0xd   :  { %403 = vmatpush.xpose.msk.msra.mxu0 %vm101_vm0, %v42_v3  ;;  %v234_v23 = vld [vmem:[%s793_s4 + $0x18] sm:$0xff]  ;;  %v233_v26 = vld [vmem:[%s793_s4 + $0x10] sm:$0xff]  ;;  %v30_v27 = vld [vmem:[%s789_s0 + $0x8] sm:$0xff] }
   0xe   :  { %v56_v24 = vld [vmem:[%s791_s2 + $0x18] sm:$0xff]  ;;  %v55_v28 = vld [vmem:[%s791_s2 + $0x10] sm:$0xff]  ;;  %v231_v29 = vld [vmem:[%s793_s4] sm:$0xff] }
   0xf   :  { %78 = vperm.xlu2 %470, %v56_v24   ;;  %v29_v30 = vld [vmem:[%s789_s0] sm:$0xff]  ;;  %v50_v32 = vld [vmem:[%s790_s1 + $0x28] sm:$0xff]  ;;  %v48_v33 = vld [vmem:[%s790_s1 + $0x18] sm:$0xff] }
  0x10   :  { %441 = vmatpush.xpose.msk.msra.mxu3 %vm101_vm0, %v41_v4  ;;  %440 = vmatpush.xpose.msk.msra.mxu2 %vm101_vm0, %v41_v4  ;;  %v354_v31 = vld [vmem:[#allocation2] sm:$0x1]  ;;  %v238_v35 = vld [vmem:[%s793_s4 + $0x38] sm:$0xff]  ;;  %v51_v36 = vld [vmem:[%s790_s1 + $0x30] sm:$0xff] }
  0x11   :  { %404 = vmatpush.xpose.msk.msra.mxu0 %vm101_vm0, %v41_v4  ;;  %93 = vperm.xlu0 %468, %v59_v11   ;;  %v45_v34 = vld [vmem:[%s790_s1] sm:$0xff]  ;;  %v46_v38 = vld [vmem:[%s790_s1 + $0x8] sm:$0xff]  ;;  %v52_v40 = vld [vmem:[%s790_s1 + $0x38] sm:$0xff] }
  0x12   :  { %83 = vperm.xlu1 %469, %v57_v13   ;;  %v49_v37 = vld [vmem:[%s790_s1 + $0x20] sm:$0xff]  ;;  %v47_v41 = vld [vmem:[%s790_s1 + $0x10] sm:$0xff]  ;;  %v232_v42 = vld [vmem:[%s793_s4 + $0x8] sm:$0xff] }
  0x13   :  { %v235_v39 = vld [vmem:[%s793_s4 + $0x20] sm:$0xff]  ;;  %v225_v13 = vld [vmem:[%s792_s3 + $0x10] sm:$0xff] }
  0x14   :  { %443 = vmatpush.xpose.msk.msra.mxu3 %vm101_vm0, %v40_v5  ;;  %442 = vmatpush.xpose.msk.msra.mxu2 %vm101_vm0, %v40_v5 }
  0x15   :  { %405 = vmatpush.xpose.msk.msra.mxu0 %vm101_vm0, %v40_v5 }
  0x17   :  { %73 = vperm.xlu2 %470, %v55_v28  }
  0x18   :  { %445 = vmatpush.xpose.msk.msra.mxu3 %vm101_vm0, %v39_v7  ;;  %444 = vmatpush.xpose.msk.msra.mxu2 %vm101_vm0, %v39_v7 }
  0x19   :  { %406 = vmatpush.xpose.msk.msra.mxu0 %vm101_vm0, %v39_v7  ;;  %68 = vperm.xlu0 %468, %v54_v15   ;;  %v227_v15 = vld [vmem:[%s792_s3 + $0x20] sm:$0xff] }
  0x1a   :  { %63 = vperm.xlu1 %469, %v53_v17   ;;  %v229_v17 = vld [vmem:[%s792_s3 + $0x30] sm:$0xff] }
  0x1c   :  { %447 = vmatpush.xpose.msk.msra.mxu3 %vm101_vm0, %v38_v10  ;;  %446 = vmatpush.xpose.msk.msra.mxu2 %vm101_vm0, %v38_v10 }
  0x1d   :  { %407 = vmatpush.xpose.msk.msra.mxu0 %vm101_vm0, %v38_v10  ;;  %v223_v10 = vld [vmem:[%s792_s3] sm:$0xff] }
  0x1f   :  { %276 = vperm.xlu2 %470, %v238_v35  }
  0x20   :  { %449 = vmatpush.xpose.msk.msra.mxu3 %vm101_vm0, %v37_v12  ;;  %448 = vmatpush.xpose.msk.msra.mxu2 %vm101_vm0, %v37_v12 }
  0x21   :  { %408 = vmatpush.xpose.msk.msra.mxu0 %vm101_vm0, %v37_v12  ;;  %271 = vperm.xlu0 %468, %v237_v19   ;;  %v224_v12 = vld [vmem:[%s792_s3 + $0x8] sm:$0xff] }
  0x22   :  { %266 = vperm.xlu1 %469, %v236_v21  }
  0x24   :  { %451 = vmatpush.xpose.msk.msra.mxu3 %vm101_vm0, %v36_v14  ;;  %450 = vmatpush.xpose.msk.msra.mxu2 %vm101_vm0, %v36_v14 }
  0x25   :  { %409 = vmatpush.xpose.msk.msra.mxu0 %vm101_vm0, %v36_v14  ;;  %v226_v14 = vld [vmem:[%s792_s3 + $0x18] sm:$0xff] }
  0x27   :  { %261 = vperm.xlu2 %470, %v235_v39  }
  0x28   :  { %453 = vmatpush.xpose.msk.msra.mxu3 %vm101_vm0, %v35_v16  ;;  %452 = vmatpush.xpose.msk.msra.mxu2 %vm101_vm0, %v35_v16 }
  0x29   :  { %410 = vmatpush.xpose.msk.msra.mxu0 %vm101_vm0, %v35_v16  ;;  %256 = vperm.xlu0 %468, %v234_v23   ;;  %v228_v16 = vld [vmem:[%s792_s3 + $0x28] sm:$0xff] }
  0x2a   :  { %251 = vperm.xlu1 %469, %v233_v26  }
  0x2c   :  { %455 = vmatpush.xpose.msk.msra.mxu3 %vm101_vm0, %v34_v18  ;;  %454 = vmatpush.xpose.msk.msra.mxu2 %vm101_vm0, %v34_v18 }
  0x2d   :  { %411 = vmatpush.xpose.msk.msra.mxu0 %vm101_vm0, %v34_v18  ;;  %v230_v18 = vld [vmem:[%s792_s3 + $0x38] sm:$0xff] }
  0x2f   :  { %246 = vperm.xlu2 %470, %v232_v42  }
  0x30   :  { %457 = vmatpush.xpose.msk.msra.mxu3 %vm101_vm0, %v33_v20  ;;  %456 = vmatpush.xpose.msk.msra.mxu2 %vm101_vm0, %v33_v20 }
  0x31   :  { %412 = vmatpush.xpose.msk.msra.mxu0 %vm101_vm0, %v33_v20  ;;  %241 = vperm.xlu0 %468, %v231_v29  }
  0x32   :  { %357 = vperm.xlu1 %469, %v354_v31  }
  0x34   :  { %459 = vmatpush.xpose.msk.msra.mxu3 %vm101_vm0, %v32_v22  ;;  %458 = vmatpush.xpose.msk.msra.mxu2 %vm101_vm0, %v32_v22 }
  0x35   :  { %413 = vmatpush.xpose.msk.msra.mxu0 %vm101_vm0, %v32_v22 }
  0x38   :  { %461 = vmatpush.xpose.msk.msra.mxu3 %vm101_vm0, %v31_v25  ;;  %460 = vmatpush.xpose.msk.msra.mxu2 %vm101_vm0, %v31_v25 }
  0x39   :  { %414 = vmatpush.xpose.msk.msra.mxu0 %vm101_vm0, %v31_v25 }
  0x3c   :  { %463 = vmatpush.xpose.msk.msra.mxu3 %vm101_vm0, %v30_v27  ;;  %462 = vmatpush.xpose.msk.msra.mxu2 %vm101_vm0, %v30_v27 }
  0x3d   :  { %415 = vmatpush.xpose.msk.msra.mxu0 %vm101_vm0, %v30_v27 }
  0x40   :  { %465 = vmatpush.xpose.msk.msra.mxu3 %vm101_vm0, %v29_v30  ;;  %464 = vmatpush.xpose.msk.msra.mxu2 %vm101_vm0, %v29_v30 }
  0x41   :  { %416 = vmatpush.xpose.msk.msra.mxu0 %vm101_vm0, %v29_v30 }
  0x43   :  { %422 = vmatmul.msk.f32.vlgmr.msra.gmra.mxu3 %vm101_vm0, %v50_v32  ;;  %420 = vmatmul.msk.f32.vlgmr.msra.gmra.mxu2 %vm101_vm0, %v48_v33 }
  0x44   :  { %417 = vmatmul.msk.f32.vlgmr.msra.gmra.mxu0 %vm101_vm0, %v45_v34 }
  0x4b   :  { %423 = vmatmul.msk.f32.gmra.mxu3 %vm101_vm0, %v51_v36  ;;  %421 = vmatmul.msk.f32.gmra.mxu2 %vm101_vm0, %v49_v37 }
  0x4c   :  { %418 = vmatmul.msk.f32.gmra.mxu0 %vm101_vm0, %v46_v38 }
  0x53   :  { %424 = vmatmul.msk.f32.gmra.mxu3 %vm101_vm0, %v52_v40 }
  0x54   :  { %419 = vmatmul.msk.f32.gmra.mxu0 %vm101_vm0, %v47_v41 }
  0x69   :  { %v79_v50 = vpop.permute.xlu2 %78 }
  0x71   :  { %v74_v61 = vpop.permute.xlu2 %73 }
  0x79   :  { %v277_v25 = vpop.permute.xlu2 %276 }
  0x7b   :  { %v99_v45 = vpop.permute.xlu0 %98 }
  0x7c   :  { %v89_v46 = vpop.permute.xlu1 %88 }
  0x81   :  { %v262_v29 = vpop.permute.xlu2 %261 }
  0x83   :  { %v94_v51 = vpop.permute.xlu0 %93 }
  0x84   :  { %v84_v55 = vpop.permute.xlu1 %83 }
  0x89   :  { %v247_v40 = vpop.permute.xlu2 %246 }
  0x8b   :  { %v69_v0 = vpop.permute.xlu0 %68 }
  0x8c   :  { %v64_v3 = vpop.permute.xlu1 %63 }
  0x93   :  { %v272_v26 = vpop.permute.xlu0 %271 }
  0x94   :  { %v267_v28 = vpop.permute.xlu1 %266 }
  0x9b   :  { %v257_v33 = vpop.permute.xlu0 %256 }
  0x9c   :  { %v252_v37 = vpop.permute.xlu1 %251 }
  0xc1   :  { %v191_v44 = vpop.f32.mrf.mxu0 }
  0xc2   :  { %v192_v5 = vadd.f32 %v191_v44, %v64_v3 }
  0xc6   :  { %v206_v43 = vpop.f32.mrf.mxu3  ;;  %v200_v47 = vpop.f32.mrf.mxu2 }
  0xc7   :  { %v207_v57 = vadd.f32 %v206_v43, %v89_v46  ;;  %v201_v60 = vadd.f32 %v200_v47, %v79_v50  ;;  %v242_v43 = vpop.permute.xlu0 %241  ;;  %v353_v50 = vld [vmem:[%s794_s5] sm:$0x1] }
  0xc9   :  { %v194_v49 = vpop.f32.mrf.mxu0 }
  0xca   :  { %v195_v2 = vadd.f32 %v194_v49, %v69_v0 }
  0xce   :  { %v209_v48 = vpop.f32.mrf.mxu3  ;;  %v203_v56 = vpop.f32.mrf.mxu2 }
  0xcf   :  { %v210_v53 = vadd.f32 %v209_v48, %v94_v51  ;;  %v204_v58 = vadd.f32 %v203_v56, %v84_v55 }
  0xd1   :  { %v197_v59 = vpop.f32.mrf.mxu0 }
  0xd2   :  { %v198_v63 = vadd.f32 %v197_v59, %v74_v61 }
  0xd6   :  { %v212_v52 = vpop.f32.mrf.mxu3 }
  0xd7   :  { %v213_v54 = vadd.f32 %v212_v52, %v99_v45  ;;  %v358_v52 = vpop.permute.xlu1 %357 }
  0xd9   :  { %471 = vtanh.f32 %v213_v54 }
  0xda   :  { %473 = vtanh.f32 %v210_v53  ;;  %v360_v53 = vperm.slane %v358_v52, 0 }
  0xdb   :  { %475 = vtanh.f32 %v207_v57 }
  0xdc   :  { %477 = vtanh.f32 %v204_v58 }
  0xdd   :  { %479 = vtanh.f32 %v201_v60 }
  0xde   :  { %481 = vtanh.f32 %v198_v63 }
  0xdf   :  { %v472_v62 = vpop.eup %471  ;;  %483 = vtanh.f32 %v195_v2 }
  0xe0   :  { %312 = vmatpush.msra.mxu1 %v472_v62  ;;  %v474_v1 = vpop.eup %473  ;;  %485 = vtanh.f32 %v192_v5 }
  0xe1   :  { %v476_v4 = vpop.eup %475 }
  0xe2   :  { %313 = vmatpush.msra.mxu1 %v474_v1  ;;  %v478_v6 = vpop.eup %477 }
  0xe3   :  { %v480_v7 = vpop.eup %479 }
  0xe4   :  { %314 = vmatpush.msra.mxu1 %v476_v4  ;;  %v482_v8 = vpop.eup %481 }
  0xe5   :  { %v484_v9 = vpop.eup %483 }
  0xe6   :  { %315 = vmatpush.msra.mxu1 %v478_v6  ;;  %v486_v11 = vpop.eup %485 }
  0xe8   :  { %316 = vmatpush.msra.mxu1 %v480_v7 }
  0xea   :  { %317 = vmatpush.msra.mxu1 %v482_v8 }
  0xec   :  { %318 = vmatpush.msra.mxu1 %v484_v9 }
  0xee   :  { %319 = vmatpush.msra.mxu1 %v486_v11 }
  0xef   :  { %425 = vmatmul.msk.f32.vlgmr.msra.gmra.mxu1 %vm279_vm1, %v223_v10 }
  0xf7   :  { %426 = vmatmul.msk.f32.gmra.mxu1 %vm279_vm1, %v224_v12 }
  0xff   :  { %427 = vmatmul.msk.f32.gmra.mxu1 %vm279_vm1, %v225_v13 }
 0x107   :  { %428 = vmatmul.msk.f32.gmra.mxu1 %vm279_vm1, %v226_v14 }
 0x10f   :  { %429 = vmatmul.msk.f32.gmra.mxu1 %vm279_vm1, %v227_v15 }
 0x117   :  { %430 = vmatmul.msk.f32.gmra.mxu1 %vm279_vm1, %v228_v16 }
 0x11f   :  { %431 = vmatmul.msk.f32.gmra.mxu1 %vm279_vm1, %v229_v17 }
 0x127   :  { %432 = vmatmul.msk.f32.gmra.mxu1 %vm279_vm1, %v230_v18 }
 0x16c   :  { %v321_v19 = vpop.f32.mrf.mxu1 }
 0x16d   :  { %v322_v45 = vadd.f32 %v321_v19, %v242_v43 }
 0x174   :  { %v324_v20 = vpop.f32.mrf.mxu1 }
 0x175   :  { %v325_v42 = vadd.f32 %v324_v20, %v247_v40 }
 0x17c   :  { %v327_v21 = vpop.f32.mrf.mxu1 }
 0x17d   :  { %v328_v39 = vadd.f32 %v327_v21, %v252_v37 }
 0x184   :  { %v330_v22 = vpop.f32.mrf.mxu1 }
 0x185   :  { %v331_v36 = vadd.f32 %v330_v22, %v257_v33 }
 0x18c   :  { %v333_v23 = vpop.f32.mrf.mxu1 }
 0x18d   :  { %v334_v35 = vadd.f32 %v333_v23, %v262_v29 }
 0x194   :  { %v336_v24 = vpop.f32.mrf.mxu1 }
 0x195   :  { %v337_v34 = vadd.f32 %v336_v24, %v267_v28 }
 0x19c   :  { %v339_v27 = vpop.f32.mrf.mxu1 }
 0x19d   :  { %v340_v31 = vadd.f32 %v339_v27, %v272_v26 }
 0x1a4   :  { %v342_v30 = vpop.f32.mrf.mxu1 }
 0x1a5   :  { %v343_v32 = vadd.f32 %v342_v30, %v277_v25 }
 0x1a7   :  { %487 = vtanh.f32 %v343_v32 }
 0x1a8   :  { %489 = vtanh.f32 %v340_v31 }
 0x1a9   :  { %491 = vtanh.f32 %v337_v34 }
 0x1aa   :  { %493 = vtanh.f32 %v334_v35 }
 0x1ab   :  { %495 = vtanh.f32 %v331_v36 }
 0x1ac   :  { %497 = vtanh.f32 %v328_v39 }
 0x1ad   :  { %v488_v38 = vpop.eup %487  ;;  %499 = vtanh.f32 %v325_v42 }
 0x1ae   :  { %372 = vmatpush.msrb.mxu2 %v488_v38  ;;  %v490_v41 = vpop.eup %489  ;;  %501 = vtanh.f32 %v322_v45 }
 0x1af   :  { %v492_v44 = vpop.eup %491 }
 0x1b0   :  { %373 = vmatpush.msrb.mxu2 %v490_v41  ;;  %v494_v46 = vpop.eup %493 }
 0x1b1   :  { %v496_v47 = vpop.eup %495 }
 0x1b2   :  { %374 = vmatpush.msrb.mxu2 %v492_v44  ;;  %v498_v48 = vpop.eup %497 }
 0x1b3   :  { %v500_v49 = vpop.eup %499 }
 0x1b4   :  { %375 = vmatpush.msrb.mxu2 %v494_v46  ;;  %v502_v51 = vpop.eup %501 }
 0x1b6   :  { %376 = vmatpush.msrb.mxu2 %v496_v47 }
 0x1b8   :  { %377 = vmatpush.msrb.mxu2 %v498_v48 }
 0x1ba   :  { %378 = vmatpush.msrb.mxu2 %v500_v49 }
 0x1bc   :  { %379 = vmatpush.msrb.mxu2 %v502_v51 }
 0x1bd   :  { %433 = vmatmul.msk.f32.vlgmr.msrb.gmra.mxu2 %vm279_vm1, %v353_v50 }
 0x240   :  { %v381_v54 = vpop.f32.mrf.mxu2 }
 0x241   :  { %v382_v55 = vadd.f32 %v381_v54, %v360_v53 }
 0x243   :  { %384 = vst [vmem:[#allocation3] sm:$0x1] %v382_v55 }
 0x244   :  { %395 = dma.vmem_to_hbm [thread:$0]  %s391_s22, 16, %s393_s25, [#allocation4]  }
 0x245   :  { %527 = dma.done.wait [#allocation4], 16  }
 0x246   :  { %528 = vsyncadd [#allocation4], 4294967280 }
 0x247   :  { %400 = vsyncpa [#allocation4], 1 }

</bundles_post_ra>
